<compile_context>
chip_gen: v7x
topology: tpu7x:2x2x1
jax: 0.10.0
libtpu: 0.0.40
codegen_flags: <defaults>
</compile_context>

<pallas_src>
import functools

import jax
import jax.numpy as jnp
from jax import lax
from jax.experimental import pallas as pl
from jax.experimental.pallas import tpu as pltpu


def _l_color_kernel(x_ref, o_ref, acc_ref, *, h, w, th, mask_rows):
    # x_ref : (TB, 3, TH, W) input tile in VMEM
    # o_ref : (TB, 1) output tile (reshaped to (B,1,1,1) in the wrapper)
    # acc_ref: (TB, 3, W) float32 partial-sum accumulator (persistent scratch)
    j = pl.program_id(1)
    nh = pl.num_programs(1)

    @pl.when(j == 0)
    def _init():
        acc_ref[...] = jnp.zeros_like(acc_ref)

    # Accumulate in float32 regardless of the input dtype.
    x = x_ref[...].astype(jnp.float32)
    if mask_rows:
        # Mask rows of the (possibly out-of-bounds) tail tile.
        row = lax.broadcasted_iota(jnp.int32, x.shape, 2) + j * th
        x = jnp.where(row < h, x, 0.0)

    # Per-tile sublane (row) reduction only; the expensive lane reduction is
    # deferred to the finalize step (once per image, not once per tile).
    acc_ref[...] += jnp.sum(x, axis=2)  # (TB, 3, W)

    @pl.when(j == nh - 1)
    def _finalize():
        sums = jnp.sum(acc_ref[...], axis=-1)  # (TB, 3) single lane reduction
        means = sums * (1.0 / (h * w))
        mr = means[:, 0:1]
        mg = means[:, 1:2]
        mb = means[:, 2:3]
        drg = (mr - mg) ** 2
        drb = (mr - mb) ** 2
        dgb = (mb - mg) ** 2
        k = jnp.sqrt(drg * drg + drb * drb + dgb * dgb)  # (TB, 1)
        o_ref[...] = k.astype(o_ref.dtype)


def _choose_tiles(b, h, w, itemsize, tile_rows=None):
    """Pick (TB, TH) so one tile is ~4 MiB (double-buffered ≈ 8 MiB)."""
    target_bytes = 4 * 1024 * 1024
    row_bytes = 3 * w * itemsize
    if tile_rows is not None:
        th = min(int(tile_rows), h)
    else:
        th = min(h, max(8, target_bytes // max(row_bytes, 1)))
    if th < h:
        th = max(8, (th // 8) * 8)  # sublane dim must be a multiple of 8
    else:
        th = h
    tile_bytes = 3 * th * w * itemsize
    tb = 1
    if th == h:
        # Whole image fits in one tile: fuse batch elements to amortize the
        # per-grid-step overhead for small images.
        tb = int(min(b, max(1, target_bytes // max(tile_bytes, 1))))
    return tb, th


def l_color(x, *, tile_rows=None):
    """Pallas implementation of L_color.forward. x: (B, 3, H, W) -> (B, 1, 1, 1)."""
    b, c, h, w = x.shape
    assert c == 3, "L_color expects 3 channels (RGB)"
    itemsize = jnp.dtype(x.dtype).itemsize

    tb, th = _choose_tiles(b, h, w, itemsize, tile_rows)
    nb = pl.cdiv(b, tb)
    nh = pl.cdiv(h, th)
    mask_rows = (h % th) != 0

    kernel = functools.partial(_l_color_kernel, h=h, w=w, th=th, mask_rows=mask_rows)

    cost = pl.CostEstimate(
        flops=int(3 * b * h * w),                             # spatial-sum adds
        transcendentals=int(b),                               # one sqrt per image
        bytes_accessed=int(3 * b * h * w * itemsize + b * itemsize),
    )

    out = pl.pallas_call(
        kernel,
        out_shape=jax.ShapeDtypeStruct((b, 1), x.dtype),
        grid=(nb, nh),
        in_specs=[pl.BlockSpec((tb, 3, th, w), lambda i, j: (i, 0, j, 0))],
        out_specs=pl.BlockSpec((tb, 1), lambda i, j: (i, 0)),
        scratch_shapes=[pltpu.VMEM((tb, 3, w), jnp.float32)],
        compiler_params=pltpu.CompilerParams(
            dimension_semantics=("parallel", "arbitrary"),
        ),
        cost_estimate=cost,
    )(x)
    return out.reshape(b, 1, 1, 1)


def _l_color_ref(x):
    # Pure-JAX reference mirroring the PyTorch module (f32 accumulation).
    mean_rgb = jnp.mean(x.astype(jnp.float32), axis=(2, 3), keepdims=True)  # (B,3,1,1)
    mr = mean_rgb[:, 0:1]
    mg = mean_rgb[:, 1:2]
    mb = mean_rgb[:, 2:3]
    drg = (mr - mg) ** 2
    drb = (mr - mb) ** 2
    dgb = (mb - mg) ** 2
    return jnp.sqrt(drg ** 2 + drb ** 2 + dgb ** 2).astype(x.dtype)  # (B,1,1,1)


if __name__ == "__main__":
    key0, key1 = jax.random.split(jax.random.PRNGKey(0))

    # Small shape consistent with the module: (B, 3, H, W); single-tile path.
    B, C, H, W = 2, 3, 16, 16
    x = jax.random.uniform(key0, (B, C, H, W), dtype=jnp.float32)
    out = jax.block_until_ready(l_color(x))
    ref = jax.block_until_ready(_l_color_ref(x))
    assert out.shape == (B, 1, 1, 1), out.shape
    assert jnp.allclose(out, ref, atol=1e-6, rtol=1e-5), (out, ref)

    # Exercise the tiled spatial-reduction path (multi-step grid + tail mask).
    x2 = jax.random.uniform(key1, (2, 3, 200, 256), dtype=jnp.float32)
    out2 = jax.block_until_ready(l_color(x2, tile_rows=48))
    ref2 = jax.block_until_ready(_l_color_ref(x2))
    assert jnp.allclose(out2, ref2, atol=1e-5, rtol=1e-5), (out2, ref2)

    print("KERNEL_OK")
</pallas_src>

<mosaic_0001>
module attributes {stable_mosaic.version = 11 : i64} {
  func.func @_l_color_kernel(%arg0: i32, %arg1: i32, %arg2: memref<2x3x16x16xf32, #tpu.memory_space<vmem>>, %arg3: memref<2x1xf32, #tpu.memory_space<vmem>>, %arg4: memref<2x3x16xf32, #tpu.memory_space<vmem>>) attributes {dimension_semantics = [#tpu.dimension_semantics<parallel>, #tpu.dimension_semantics<arbitrary>], iteration_bounds = array<i64: 1, 1>, scalar_prefetch = 0 : i64, scratch_operands = 1 : i64, tpu.core_type = #tpu.core_type<tc>, window_params = [{transform_indices = @transform_0, window_bounds = array<i64: 2, 3, 16, 16>}, {transform_indices = @transform_1, window_bounds = array<i64: 2, 1>}]} {
    %c0_i32 = arith.constant 0 : i32
    %0 = arith.cmpi eq, %arg1, %c0_i32 : i32
    %1 = arith.extui %0 : i1 to i32
    %c0_i32_0 = arith.constant 0 : i32
    %2 = arith.cmpi ne, %1, %c0_i32_0 : i32
    scf.if %2 {
      %cst_12 = arith.constant 0.000000e+00 : f32
      %11 = vector.broadcast %cst_12 : f32 to vector<2x3x16xf32>
      %c0_13 = arith.constant 0 : index
      %c0_14 = arith.constant 0 : index
      %c0_15 = arith.constant 0 : index
      %12 = vector.load %arg4[%c0_13, %c0_14, %c0_15] : memref<2x3x16xf32, #tpu.memory_space<vmem>>, vector<2x3x16xf32>
      tpu.vector_store %arg4[%c0_13, %c0_14, %c0_15], %11 {strides = array<i32>} : memref<2x3x16xf32, #tpu.memory_space<vmem>>, vector<2x3x16xf32>,
    } else {
    }
    %c0 = arith.constant 0 : index
    %c0_1 = arith.constant 0 : index
    %c0_2 = arith.constant 0 : index
    %c0_3 = arith.constant 0 : index
    %3 = vector.load %arg2[%c0, %c0_1, %c0_2, %c0_3] : memref<2x3x16x16xf32, #tpu.memory_space<vmem>>, vector<2x3x16x16xf32>
    %c0_4 = arith.constant 0 : index
    %c0_5 = arith.constant 0 : index
    %c0_6 = arith.constant 0 : index
    %4 = vector.load %arg4[%c0_4, %c0_5, %c0_6] : memref<2x3x16xf32, #tpu.memory_space<vmem>>, vector<2x3x16xf32>
    %cst = arith.constant dense<0.000000e+00> : vector<2x3x16xf32>
    %5 = vector.multi_reduction <add>, %3, %cst [2] : vector<2x3x16x16xf32> to vector<2x3x16xf32>
    %6 = arith.addf %4, %5 : vector<2x3x16xf32>
    %c0_7 = arith.constant 0 : index
    %c0_8 = arith.constant 0 : index
    %c0_9 = arith.constant 0 : index
    %7 = vector.load %arg4[%c0_7, %c0_8, %c0_9] : memref<2x3x16xf32, #tpu.memory_space<vmem>>, vector<2x3x16xf32>
    tpu.vector_store %arg4[%c0_7, %c0_8, %c0_9], %6 {strides = array<i32>} : memref<2x3x16xf32, #tpu.memory_space<vmem>>, vector<2x3x16xf32>,
    %c0_i32_10 = arith.constant 0 : i32
    %8 = arith.cmpi eq, %arg1, %c0_i32_10 : i32
    %9 = arith.extui %8 : i1 to i32
    %c0_i32_11 = arith.constant 0 : i32
    %10 = arith.cmpi ne, %9, %c0_i32_11 : i32
    scf.if %10 {
      %c0_12 = arith.constant 0 : index
      %c0_13 = arith.constant 0 : index
      %c0_14 = arith.constant 0 : index
      %11 = vector.load %arg4[%c0_12, %c0_13, %c0_14] : memref<2x3x16xf32, #tpu.memory_space<vmem>>, vector<2x3x16xf32>
      %cst_15 = arith.constant dense<0.000000e+00> : vector<2x3xf32>
      %12 = vector.multi_reduction <add>, %11, %cst_15 [2] : vector<2x3x16xf32> to vector<2x3xf32>
      %cst_16 = arith.constant 3.906250e-03 : f32
      %13 = vector.broadcast %cst_16 : f32 to vector<2x3xf32>
      %14 = arith.mulf %12, %13 : vector<2x3xf32>
      %15 = vector.extract_strided_slice %14 {offsets = [0, 0], sizes = [2, 1], strides = [1, 1]} : vector<2x3xf32> to vector<2x1xf32>
      %16 = vector.extract_strided_slice %14 {offsets = [0, 1], sizes = [2, 1], strides = [1, 1]} : vector<2x3xf32> to vector<2x1xf32>
      %17 = vector.extract_strided_slice %14 {offsets = [0, 2], sizes = [2, 1], strides = [1, 1]} : vector<2x3xf32> to vector<2x1xf32>
      %18 = arith.subf %15, %16 : vector<2x1xf32>
      %19 = arith.mulf %18, %18 : vector<2x1xf32>
      %20 = arith.subf %15, %17 : vector<2x1xf32>
      %21 = arith.mulf %20, %20 : vector<2x1xf32>
      %22 = arith.subf %17, %16 : vector<2x1xf32>
      %23 = arith.mulf %22, %22 : vector<2x1xf32>
      %24 = arith.mulf %19, %19 : vector<2x1xf32>
      %25 = arith.mulf %21, %21 : vector<2x1xf32>
      %26 = arith.addf %24, %25 : vector<2x1xf32>
      %27 = arith.mulf %23, %23 : vector<2x1xf32>
      %28 = arith.addf %26, %27 : vector<2x1xf32>
      %29 = math.sqrt %28 : vector<2x1xf32>
      %c0_17 = arith.constant 0 : index
      %c0_18 = arith.constant 0 : index
      %30 = vector.load %arg3[%c0_17, %c0_18] : memref<2x1xf32, #tpu.memory_space<vmem>>, vector<2x1xf32>
      tpu.vector_store %arg3[%c0_17, %c0_18], %29 {strides = array<i32>} : memref<2x1xf32, #tpu.memory_space<vmem>>, vector<2x1xf32>,
    } else {
    }
    return
  }
  func.func @transform_0(%arg0: i32, %arg1: i32) -> (i32, i32, i32, i32) {
    %c0_i32 = arith.constant 0 : i32
    %c0_i32_0 = arith.constant 0 : i32
    %c0_i32_1 = arith.constant 0 : i32
    return %arg0, %c0_i32, %arg1, %c0_i32_0 : i32, i32, i32, i32
  }
  func.func @transform_1(%arg0: i32, %arg1: i32) -> (i32, i32) {
    %c0_i32 = arith.constant 0 : i32
    %c0_i32_0 = arith.constant 0 : i32
    return %arg0, %c0_i32 : i32, i32
  }
}

</mosaic_0001>

<bundles_post_ra>
// kernel: tpu_custom_call.1
= control target key start
LH: loop header
LB: loop body
LE: loop exit
PB: predicated region body
PF: predicated region fallthrough
CT: control target
= control target key end

     0   :  { %6 = vsyncpa [#allocation4], 0  ;;  %s230_s6 = smov [#allocation3]   ;;  %s280_s0 = inlined_call_operand.hbm [shape: f32[2,3,16,16], index: 0, kind: input, shape index: {}]   ;;  %s281_s1 = inlined_call_operand.vmem [shape: f32[2,1], index: 1, kind: output, shape index: {}]  }
   0x1   :  { %s12_s7 = sshll.u32 %s230_s6, 4  ;;  %s206_s10 = scalar_lea.hbm %s280_s0, 1536  ;;  %s13_s7 = int_to_ptr.vmem [resolvable:$true] %s12_s7 }
   0x2   :  { %p207_p0 = scmp.ne.s32.totalorder %s280_s0, %s206_s10  ;;  %p210_p1 = scmp.lt.u32.totalorder %s206_s10, %s280_s0 }
   0x4   :  { %p212_p2 = pnand %p210_p1, %p207_p0 }
   0x6   :  { %215 = shalt.err (!%p212_p2)
}
   0x7   :  { %s216_s15 = scalar_lea.vmem %s13_s7, 1536  ;;  %p221_p4 = scmp.lt.s32.totalorder %s13_s7, %s13_s7 }
   0x8   :  { %p217_p3 = scmp.ne.s32.totalorder %s13_s7, %s216_s15  ;;  %p222_p5 = scmp.lt.s32.totalorder %s216_s15, %s216_s15 }
   0xa   :  { %p223_p6 = por %p222_p5, %p221_p4 }
   0xc   :  { %p224_p7 = pnand %p223_p6, %p217_p3 }
   0xe   :  { %227 = shalt.err (!%p224_p7)
}
   0xf   :  { %s231_s16 = smov 128   ;;  %s232_s17 = smov 8  }
  0x10   :  { %18 = dma.hbm_to_vmem [thread:$0]  %s280_s0, 1536, %s13_s7, [#allocation4], %s231_s16, %s231_s16, %s232_s17  }
  0x11   :  { %228 = dma.done.wait [#allocation4], 1536  }
  0x12   :  { %229 = vsyncadd [#allocation4], 4294965760  ;;  %vm26_vm0 = vcmask 124928   ;;  %v233_v0 = vmov 0.0   ;;  %v29_v1 = vld [vmem:[#allocation3] sm:$0xff]  ;;  %v30_v2 = vld [vmem:[#allocation3 + $0x8] sm:$0xff] }
  0x13   :  { %28 = vst.msk [vmem:[#allocation2 + $0x4] sm:$0x7] %vm26_vm0, %v233_v0  ;;  %27 = vst.msk [vmem:[#allocation2] sm:$0x7] %vm26_vm0, %v233_v0  ;;  %v31_v3 = vld [vmem:[#allocation3 + $0x10] sm:$0xff]  ;;  %vm43_vm1 = vcmask 130048  }
  0x14   :  { %v32_v4 = vld [vmem:[#allocation3 + $0x18] sm:$0xff]  ;;  %v33_v5 = vld [vmem:[#allocation3 + $0x20] sm:$0xff]  ;;  %v34_v6 = vld [vmem:[#allocation3 + $0x28] sm:$0xff]  ;;  %v44_v7 = vsel %vm43_vm1, %v29_v1, 0.0  ;;  %v45_v8 = vsel %vm43_vm1, %v30_v2, 0.0  ;;  %v53_v9 = vsel %vm43_vm1, %v31_v3, 0.0 }
  0x15   :  { %v35_v10 = vld [vmem:[#allocation3 + $0x30] sm:$0xff]  ;;  %v36_v11 = vld [vmem:[#allocation3 + $0x38] sm:$0xff]  ;;  %v37_v12 = vld [vmem:[#allocation3 + $0x40] sm:$0xff]  ;;  %v46_v13 = vadd.f32 %v45_v8, %v44_v7  ;;  %v54_v14 = vsel %vm43_vm1, %v32_v4, 0.0  ;;  %v62_v15 = vsel %vm43_vm1, %v33_v5, 0.0  ;;  %v63_v16 = vsel %vm43_vm1, %v34_v6, 0.0 }
  0x16   :  { %v38_v17 = vld [vmem:[#allocation3 + $0x48] sm:$0xff]  ;;  %v39_v18 = vld [vmem:[#allocation3 + $0x50] sm:$0xff]  ;;  %v40_v19 = vld [vmem:[#allocation3 + $0x58] sm:$0xff]  ;;  %v55_v20 = vadd.f32 %v54_v14, %v53_v9  ;;  %v64_v21 = vadd.f32 %v63_v16, %v62_v15  ;;  %v71_v22 = vsel %vm43_vm1, %v35_v10, 0.0  ;;  %v72_v23 = vsel %vm43_vm1, %v36_v11, 0.0 }
  0x17   :  { %v47_v24 = vrot.slane %v46_v13, 4  ;;  %v73_v25 = vadd.f32 %v72_v23, %v71_v22  ;;  %v80_v26 = vsel %vm43_vm1, %v37_v12, 0.0  ;;  %v81_v27 = vsel %vm43_vm1, %v38_v17, 0.0 }
  0x18   :  { %v56_v28 = vrot.slane %v55_v20, 4  ;;  %v65_v29 = vrot.slane %v64_v21, 4  ;;  %v82_v30 = vadd.f32 %v81_v27, %v80_v26  ;;  %v89_v31 = vsel %vm43_vm1, %v39_v18, 0.0 }
  0x19   :  { %v48_v32 = vadd.f32 %v47_v24, %v46_v13  ;;  %v74_v33 = vrot.slane %v73_v25, 4  ;;  %v90_v34 = vsel %vm43_vm1, %v40_v19, 0.0  ;;  %vm104_vm2 = vcmask 1041409  }
  0x1a   :  { %v57_v35 = vadd.f32 %v56_v28, %v55_v20  ;;  %v66_v36 = vadd.f32 %v65_v29, %v64_v21  ;;  %v83_v37 = vrot.slane %v82_v30, 4  ;;  %v91_v38 = vadd.f32 %v90_v34, %v89_v31  ;;  %v41_v0 = vld [vmem:[#allocation2] sm:$0x7]  ;;  %v42_v5 = vld [vmem:[#allocation2 + $0x4] sm:$0x7] }
  0x1b   :  { %v49_v39 = vrot.slane %v48_v32, 2  ;;  %v75_v40 = vadd.f32 %v74_v33, %v73_v25  ;;  %vm106_vm3 = vcmask 1042434   ;;  %vm191_vm7 = vcmask 1024  }
  0x1c   :  { %v58_v41 = vrot.slane %v57_v35, 2  ;;  %v67_v42 = vrot.slane %v66_v36, 2  ;;  %v84_v43 = vadd.f32 %v83_v37, %v82_v30  ;;  %v92_v44 = vrot.slane %v91_v38, 4 }
  0x1d   :  { %v50_v45 = vadd.f32 %v49_v39, %v48_v32  ;;  %v76_v46 = vrot.slane %v75_v40, 2 }
  0x1e   :  { %v59_v47 = vadd.f32 %v58_v41, %v57_v35  ;;  %v68_v48 = vadd.f32 %v67_v42, %v66_v36  ;;  %v85_v49 = vrot.slane %v84_v43, 2  ;;  %v93_v50 = vadd.f32 %v92_v44, %v91_v38 }
  0x1f   :  { %v51_v51 = vrot.slane %v50_v45, 1  ;;  %v77_v52 = vadd.f32 %v76_v46, %v75_v40 }
  0x20   :  { %v60_v53 = vrot.slane %v59_v47, 1  ;;  %v69_v54 = vrot.slane %v68_v48, 1  ;;  %v86_v55 = vadd.f32 %v85_v49, %v84_v43  ;;  %v94_v56 = vrot.slane %v93_v50, 2 }
  0x21   :  { %v52_v57 = vadd.f32 %v51_v51, %v50_v45  ;;  %v78_v58 = vrot.slane %v77_v52, 1 }
  0x22   :  { %v61_v59 = vadd.f32 %v60_v53, %v59_v47  ;;  %v70_v60 = vadd.f32 %v69_v54, %v68_v48  ;;  %v87_v61 = vrot.slane %v86_v55, 1  ;;  %v95_v62 = vadd.f32 %v94_v56, %v93_v50 }
  0x23   :  { %v79_v63 = vadd.f32 %v78_v58, %v77_v52 }
  0x24   :  { %v88_v1 = vadd.f32 %v87_v61, %v86_v55  ;;  %v96_v2 = vrot.slane %v95_v62, 1  ;;  %v105_v3 = vsel %vm104_vm2, %v61_v59, %v52_v57 }
  0x25   :  { %v107_v4 = vsel %vm106_vm3, %v70_v60, %v105_v3 }
  0x26   :  { %v97_v6 = vadd.f32 %v96_v2, %v95_v62  ;;  %v108_v7 = vsel %vm104_vm2, %v88_v1, %v79_v63  ;;  %v112_v8 = vadd.f32 %v107_v4, %v41_v0 }
  0x28   :  { %v109_v9 = vsel %vm106_vm3, %v97_v6, %v108_v7  ;;  %115 = vst.msk [vmem:[#allocation2] sm:$0x7] %vm26_vm0, %v112_v8 }
  0x29   :  { %v113_v10 = vadd.f32 %v109_v9, %v42_v5 }
  0x2b   :  { %116 = vst.msk [vmem:[#allocation2 + $0x4] sm:$0x7] %vm26_vm0, %v113_v10 }
  0x2f   :  { %v120_v12 = vld [vmem:[#allocation2] sm:$0x7] }
  0x30   :  { %v122_v14 = vsel %vm26_vm0, %v120_v12, 0.0 }
  0x32   :  { %v121_v11 = vld [vmem:[#allocation2 + $0x4] sm:$0x7] }
  0x33   :  { %v125_v13 = vsel %vm26_vm0, %v121_v11, 0.0 }
  0x34   :  { %126 = vadd.xlane.f32.xlu0 %v125_v13 }
  0x38   :  { %123 = vadd.xlane.f32.xlu0 %v122_v14 }
  0xc1   :  { %v127_v15 = vpop.xlane.xlu0 %126 }
  0xc2   :  { %v129_v16 = vmul.f32 0.00390625, %v127_v15 }
  0xc4   :  { %v133_v17 = vrot.slane %v129_v16, 1  ;;  %v141_v18 = vrot.slane %v129_v16, 2  ;;  %v149_v19 = vrot.slane %v129_v16, 7 }
  0xc5   :  { %v124_v20 = vpop.xlane.xlu0 %123 }
  0xc6   :  { %v137_v21 = vsub.f32 %v129_v16, %v133_v17  ;;  %v145_v22 = vsub.f32 %v129_v16, %v141_v18  ;;  %v153_v23 = vsub.f32 %v129_v16, %v149_v19  ;;  %v128_v24 = vmul.f32 0.00390625, %v124_v20 }
  0xc8   :  { %v139_v25 = vmul.f32 %v137_v21, %v137_v21  ;;  %v147_v26 = vmul.f32 %v145_v22, %v145_v22  ;;  %v155_v27 = vmul.f32 %v153_v23, %v153_v23  ;;  %v132_v28 = vrot.slane %v128_v24, 1 }
  0xc9   :  { %v140_v29 = vrot.slane %v128_v24, 2  ;;  %v148_v30 = vrot.slane %v128_v24, 7 }
  0xca   :  { %v157_v31 = vmul.f32 %v139_v25, %v139_v25  ;;  %v159_v32 = vmul.f32 %v147_v26, %v147_v26  ;;  %v163_v33 = vmul.f32 %v155_v27, %v155_v27  ;;  %v136_v34 = vsub.f32 %v128_v24, %v132_v28 }
  0xcb   :  { %v144_v35 = vsub.f32 %v128_v24, %v140_v29  ;;  %v152_v36 = vsub.f32 %v128_v24, %v148_v30 }
  0xcc   :  { %v161_v37 = vadd.f32 %v159_v32, %v157_v31  ;;  %v167_v38 = vrot.slane %v163_v33, 2  ;;  %v138_v39 = vmul.f32 %v136_v34, %v136_v34 }
  0xcd   :  { %v146_v40 = vmul.f32 %v144_v35, %v144_v35  ;;  %v154_v41 = vmul.f32 %v152_v36, %v152_v36 }
  0xce   :  { %v171_v42 = vadd.f32 %v167_v38, %v161_v37  ;;  %v156_v43 = vmul.f32 %v138_v39, %v138_v39 }
  0xcf   :  { %v158_v44 = vmul.f32 %v146_v40, %v146_v40  ;;  %v162_v45 = vmul.f32 %v154_v41, %v154_v41 }
  0xd0   :  { %202 = vrsqrt.f32 %v171_v42  ;;  %vm181_vm4 = vcmp.eq.f32.partialorder %v171_v42, inf  ;;  %v184_v52 = vand.u32 2147483648, %v171_v42  ;;  %vm183_vm5 = vcmp.eq.f32.partialorder %v171_v42, 0.0 }
  0xd1   :  { %v160_v46 = vadd.f32 %v158_v44, %v156_v43  ;;  %v166_v47 = vrot.slane %v162_v45, 2 }
  0xd3   :  { %v170_v48 = vadd.f32 %v166_v47, %v160_v46 }
  0xd5   :  { %204 = vrsqrt.f32 %v170_v48  ;;  %vm174_vm6 = vcmp.eq.f32.partialorder %v170_v48, inf  ;;  %v177_v56 = vand.u32 2147483648, %v170_v48  ;;  %vm176_vm8 = vcmp.eq.f32.partialorder %v170_v48, 0.0 }
  0xda   :  { %v203_v49 = vpop.eup %202 }
  0xdb   :  { %v180_v50 = vmul.f32 %v203_v49, %v171_v42 }
  0xdd   :  { %v182_v51 = vsel %vm181_vm4, %v171_v42, %v180_v50 }
  0xde   :  { %v185_v54 = vsel %vm183_vm5, %v184_v52, %v182_v51 }
  0xdf   :  { %v205_v53 = vpop.eup %204  ;;  %v188_v57 = vrot.slane %v185_v54, 7 }
  0xe0   :  { %v173_v55 = vmul.f32 %v205_v53, %v170_v48 }
  0xe2   :  { %v175_v58 = vsel %vm174_vm6, %v170_v48, %v173_v55 }
  0xe3   :  { %v178_v59 = vsel %vm176_vm8, %v177_v56, %v175_v58 }
  0xe4   :  { %v189_v60 = vsel %vm104_vm2, %v188_v57, %v178_v59 }
  0xe5   :  { %192 = vst.msk [vmem:[%s281_s1] sm:$0x3] %vm191_vm7, %v189_v60 }
  0xe6   :  { %197 = vsyncpa [#allocation4], 1 }

</bundles_post_ra>
